<compile_context>
chip_gen: v7x
topology: tpu7x:2x2x1
jax: 0.10.0
libtpu: 0.0.40
codegen_flags: <defaults>
</compile_context>

<pallas_src>
import functools

import jax
import jax.numpy as jnp
from jax import lax
from jax.experimental import pallas as pl
from jax.experimental.pallas import tpu as pltpu

EPS = 1e-5
VMEM_LIMIT_BYTES = 48 * 1024 * 1024   # <= v7x physical VMEM (64 MiB); fine on v5e/v6e.


def conv_stats_kernel(x_ref, w_ref, mask_ref, y_ref, psum_ref, psq_ref, acc_ref,
                      *, hw, width):
    """One image: 3x3 conv from in-VMEM tap slices + per-image BN partial stats.

    x_ref    : (1, Cin, Lf)   f32   zero-padded flattened image, Lf = hw + 2*width + 2
    w_ref    : (9, Cout, Cin) bf16  per-tap weight matrices (tap index = kh*3 + kw)
    mask_ref : (2, hw)        f32   [0] left-tap validity (w >= 1), [1] right (w <= W-2)
    y_ref    : (1, Cout, hw)  bf16  conv output (pre-BN, bf16 intermediate)
    psum_ref : (1, Cout, 1)   f32   per-image per-channel sum
    psq_ref  : (1, Cout, 1)   f32   per-image per-channel sum of squares
    acc_ref  : (Cout, hw)     f32   VMEM accumulator scratch
    """
    xp = x_ref[0]                      # (Cin, Lf) f32
    m_left = mask_ref[0:1, :]          # (1, hw)
    m_right = mask_ref[1:2, :]

    # 9 taps = 9 static lane-offset slices of the padded flat image.  Lane shifts and
    # row-wrap masking run on XLU/VPU (idle slots here); the MXU does 9 small K=Cin
    # matmuls accumulated into the VMEM scratch (no giant live f32 value in vregs).
    for kh in range(3):
        for kw in range(3):
            start = kh * width + kw
            tap = xp[:, start:start + hw]                    # (Cin, hw) f32
            if kw == 0:
                tap = tap * m_left       # zero row-wrapped left neighbours
            elif kw == 2:
                tap = tap * m_right      # zero row-wrapped right neighbours
            contrib = jnp.dot(w_ref[kh * 3 + kw], tap.astype(jnp.bfloat16),
                              preferred_element_type=jnp.float32)   # (Cout, hw) f32
            if kh == 0 and kw == 0:
                acc_ref[...] = contrib
            else:
                acc_ref[...] += contrib

    acc = acc_ref[...]
    y_ref[0] = acc.astype(y_ref.dtype)
    # Cross-lane reduce in-kernel: stats writeback is (Cout, 1) per image, not
    # (Cout, 128) per tile -> 128x less statistics traffic to HBM.
    psum_ref[0] = jnp.sum(acc, axis=-1, keepdims=True)
    psq_ref[0] = jnp.sum(acc * acc, axis=-1, keepdims=True)


def bn_apply_kernel(y_ref, scale_ref, shift_ref, o_ref):
    """One image: out = conv * scale + shift (scale/shift fold mean/var/gamma/beta)."""
    o_ref[0] = y_ref[0].astype(jnp.float32) * scale_ref[...] + shift_ref[...]


def _estimate_step_vmem_bytes(cin, cout, hw, lf):
    """Per-grid-step VMEM need, counting double buffers and the live accumulator."""
    x_blk = cin * lf * 4
    w_blk = 9 * cout * cin * 2
    m_blk = 2 * hw * 4
    y_blk = cout * hw * 2
    st_blk = 2 * cout * 4
    acc = cout * hw * 4                              # f32 accumulator scratch (single)
    return 2 * (x_blk + w_blk + m_blk + y_blk + st_blk) + acc


def conv_block_forward(x_nchw, w_oihw, bias, gamma, beta,
                       intermediate_dtype=jnp.bfloat16):
    """x_nchw: (N, Cin, H, W) f32 -> (N, Cout, H, W) f32.

    `bias` is accepted for parameter parity with nn.Conv2d but unused: under
    training-mode BatchNorm the batch-mean subtraction cancels it exactly.
    """
    del bias
    N, Cin, H, W = x_nchw.shape
    Cout = w_oihw.shape[0]
    HW = H * W
    Lf = HW + 2 * W + 2

    need = _estimate_step_vmem_bytes(Cin, Cout, HW, Lf)
    if need > VMEM_LIMIT_BYTES:
        # TODO(synk): split very large images into row groups (grid over (N, H-tiles)
        # with a 1-row halo) instead of whole-image blocks.
        raise ValueError(f"per-image VMEM need {need} B exceeds {VMEM_LIMIT_BYTES} B")

    # Padded flat layout: index (W+1) + h*W + w holds pixel (h, w); tap (kh, kw) of
    # every output pixel is then the *static* lane slice [kh*W+kw : kh*W+kw+HW].
    # Row-out-of-image reads land in the zero pad; the only garbage (row-wrapped
    # left/right neighbours at border columns) is zeroed by the column masks in-kernel.
    # One cheap pass over the small input; no 9*Cin-wide im2col ever touches HBM.
    x_pad = jnp.pad(x_nchw.reshape(N, Cin, HW), ((0, 0), (0, 0), (W + 1, W + 1)))

    # (Cout, Cin, 3, 3) -> (9, Cout, Cin), tap index kh*3 + kw, bf16 for the MXU.
    w9 = jnp.transpose(w_oihw, (2, 3, 0, 1)).reshape(9, Cout, Cin).astype(jnp.bfloat16)

    col = jnp.arange(HW, dtype=jnp.int32) % W
    masks = jnp.stack([col >= 1, col <= W - 2]).astype(jnp.float32)       # (2, HW)

    cparams = pltpu.CompilerParams(
        # Images are independent -> megacore / 2-TC sharding of the grid.
        # TODO(synk): try pltpu.CORE_PARALLEL on v7x (plain parallel vs arbitrary is
        # measured near-zero; only core_parallel changes cross-core codegen).
        dimension_semantics=("parallel",),
        vmem_limit_bytes=VMEM_LIMIT_BYTES,
    )

    # ---- kernel 1: conv (taps assembled in VMEM) + per-image BN partial stats ----
    y_conv, psum, psq = pl.pallas_call(
        functools.partial(conv_stats_kernel, hw=HW, width=W),
        out_shape=(
            jax.ShapeDtypeStruct((N, Cout, HW), intermediate_dtype),
            jax.ShapeDtypeStruct((N, Cout, 1), jnp.float32),
            jax.ShapeDtypeStruct((N, Cout, 1), jnp.float32),
        ),
        grid=(N,),
        in_specs=[
            pl.BlockSpec((1, Cin, Lf), lambda i: (i, 0, 0)),     # one padded image
            pl.BlockSpec((9, Cout, Cin), lambda i: (0, 0, 0)),   # weights (resident)
            pl.BlockSpec((2, HW), lambda i: (0, 0)),             # column masks
        ],
        out_specs=(
            pl.BlockSpec((1, Cout, HW), lambda i: (i, 0, 0)),
            pl.BlockSpec((1, Cout, 1), lambda i: (i, 0, 0)),
            pl.BlockSpec((1, Cout, 1), lambda i: (i, 0, 0)),
        ),
        scratch_shapes=[pltpu.VMEM((Cout, HW), jnp.float32)],
        compiler_params=cparams,
    )(x_pad, w9, masks)
    # TODO(synk): mark the resident weight/mask specs pipeline_mode=pl.Buffered(1)
    # (constant index maps need no second buffer) once uniformly available.

    # ---- finalize global BN statistics (O(Cout) work, plain JAX) ----
    cnt = jnp.float32(N * HW)
    mean = jnp.sum(psum, axis=(0, 2)) / cnt
    # E[x^2] - E[x]^2 in f32 is adequate at these sizes.
    # TODO(synk): per-image-shifted accumulation if |mean| >> std for huge batches.
    var = jnp.maximum(jnp.sum(psq, axis=(0, 2)) / cnt - mean * mean, 0.0)   # biased
    scale = gamma.astype(jnp.float32) * lax.rsqrt(var + EPS)
    shift = beta.astype(jnp.float32) - mean * scale

    # ---- kernel 2: per-image affine normalisation, output already NCHW-ordered ----
    out_flat = pl.pallas_call(
        bn_apply_kernel,
        out_shape=jax.ShapeDtypeStruct((N, Cout, HW), jnp.float32),
        grid=(N,),
        in_specs=[
            pl.BlockSpec((1, Cout, HW), lambda i: (i, 0, 0)),
            pl.BlockSpec((Cout, 1), lambda i: (0, 0)),
            pl.BlockSpec((Cout, 1), lambda i: (0, 0)),
        ],
        out_specs=pl.BlockSpec((1, Cout, HW), lambda i: (i, 0, 0)),
        compiler_params=cparams,
    )(y_conv, scale.reshape(Cout, 1), shift.reshape(Cout, 1))

    # Already (N, Cout, H*W) in NCHW order -> free reshape (no transpose pass).
    return out_flat.reshape(N, Cout, H, W)


def reference_forward(x_nchw, w_oihw, bias, gamma, beta,
                      input_dtype=jnp.float32, conv_round_dtype=jnp.float32):
    """Plain-JAX reference = PyTorch Conv2d(pad=1, bias) + BatchNorm2d (train mode).

    `input_dtype` optionally rounds the conv operands (kernel feeds bf16 to the MXU);
    `conv_round_dtype` optionally rounds the conv output before normalisation (kernel
    stores a bf16 intermediate).  BN stats always come from the f32 conv output,
    matching the kernel.
    """
    xq = x_nchw.astype(input_dtype).astype(jnp.float32)
    wq = w_oihw.astype(input_dtype).astype(jnp.float32)
    y = lax.conv_general_dilated(
        xq, wq, window_strides=(1, 1), padding=((1, 1), (1, 1)),
        dimension_numbers=("NCHW", "OIHW", "NCHW"),
        precision=lax.Precision.HIGHEST,
    ) + bias.reshape(1, -1, 1, 1)
    mean = jnp.mean(y, axis=(0, 2, 3), keepdims=True)
    var = jnp.mean((y - mean) ** 2, axis=(0, 2, 3), keepdims=True)    # biased
    yq = y.astype(conv_round_dtype).astype(jnp.float32)
    return (yq - mean) * lax.rsqrt(var + EPS) * gamma.reshape(1, -1, 1, 1) \
        + beta.reshape(1, -1, 1, 1)


def _run_case(key, N, Cin, Cout, H, W):
    kx, kw, kb, kg, ke = jax.random.split(key, 5)
    x = jax.random.normal(kx, (N, Cin, H, W), dtype=jnp.float32)
    fan_in = Cin * 9
    bound = 1.0 / jnp.sqrt(jnp.float32(fan_in))
    w = jax.random.uniform(kw, (Cout, Cin, 3, 3), jnp.float32, -bound, bound)
    b = jax.random.uniform(kb, (Cout,), jnp.float32, -bound, bound)
    gamma = jax.random.uniform(kg, (Cout,), jnp.float32, 0.5, 1.5)
    beta = 0.1 * jax.random.normal(ke, (Cout,), jnp.float32)

    fwd = jax.jit(conv_block_forward)
    out = jax.block_until_ready(fwd(x, w, b, gamma, beta))
    assert out.shape == (N, Cout, H, W)
    assert out.dtype == jnp.float32

    # Tight check: reference uses the same bf16-rounded operands and a bf16-rounded
    # conv intermediate -> remaining diff is accumulation-order / rounding noise.
    ref_q = reference_forward(x, w, b, gamma, beta,
                              input_dtype=jnp.bfloat16,
                              conv_round_dtype=jnp.bfloat16)
    err_q = jnp.max(jnp.abs(out - ref_q))
    assert jnp.allclose(out, ref_q, atol=3e-2, rtol=3e-2), f"tight max abs err {err_q}"

    # Loose check: full-f32 module semantics; difference = bf16 rounding only.
    ref_f = reference_forward(x, w, b, gamma, beta)
    err_f = jnp.max(jnp.abs(out - ref_f))
    assert jnp.allclose(out, ref_f, atol=8e-2, rtol=8e-2), f"loose max abs err {err_f}"


if __name__ == "__main__":
    key = jax.random.PRNGKey(0)
    k1, k2 = jax.random.split(key)
    # ConvBlock(4, 8) on a (2, 4, 16, 16) input (spec shape; 2-step image grid).
    _run_case(k1, N=2, Cin=4, Cout=8, H=16, W=16)
    # Larger case: 4-step grid (even tile count for 2-TC parts), bigger lane extent.
    _run_case(k2, N=4, Cin=8, Cout=16, H=32, W=32)
    print("KERNEL_OK")
</pallas_src>

<mosaic_0001>
module attributes {stable_mosaic.version = 11 : i64} {
  func.func @bn_apply_kernel(%arg0: i32, %arg1: memref<1x8x256xbf16, #tpu.memory_space<vmem>>, %arg2: memref<8x1xf32, #tpu.memory_space<vmem>>, %arg3: memref<8x1xf32, #tpu.memory_space<vmem>>, %arg4: memref<1x8x256xf32, #tpu.memory_space<vmem>>) attributes {dimension_semantics = [#tpu.dimension_semantics<parallel>], iteration_bounds = array<i64: 2>, scalar_prefetch = 0 : i64, scratch_operands = 0 : i64, tpu.core_type = #tpu.core_type<tc>, window_params = [{transform_indices = @transform_0, window_bounds = array<i64: 1, 8, 256>}, {pipeline_mode = #tpu.pipeline_mode<synchronous>, transform_indices = @transform_1, window_bounds = array<i64: 8, 1>}, {pipeline_mode = #tpu.pipeline_mode<synchronous>, transform_indices = @transform_2, window_bounds = array<i64: 8, 1>}, {transform_indices = @transform_3, window_bounds = array<i64: 1, 8, 256>}]} {
    %c0 = arith.constant 0 : index
    %c0_0 = arith.constant 0 : index
    %c0_1 = arith.constant 0 : index
    %0 = vector.load %arg1[%c0, %c0_0, %c0_1] : memref<1x8x256xbf16, #tpu.memory_space<vmem>>, vector<1x8x256xbf16>
    %1 = vector.shape_cast %0 : vector<1x8x256xbf16> to vector<8x256xbf16>
    %2 = arith.extf %1 : vector<8x256xbf16> to vector<8x256xf32>
    %c0_2 = arith.constant 0 : index
    %c0_3 = arith.constant 0 : index
    %3 = vector.load %arg2[%c0_2, %c0_3] : memref<8x1xf32, #tpu.memory_space<vmem>>, vector<8x1xf32>
    %4 = vector.broadcast %3 : vector<8x1xf32> to vector<8x256xf32>
    %5 = arith.mulf %2, %4 : vector<8x256xf32>
    %c0_4 = arith.constant 0 : index
    %c0_5 = arith.constant 0 : index
    %6 = vector.load %arg3[%c0_4, %c0_5] : memref<8x1xf32, #tpu.memory_space<vmem>>, vector<8x1xf32>
    %7 = vector.broadcast %6 : vector<8x1xf32> to vector<8x256xf32>
    %8 = arith.addf %5, %7 : vector<8x256xf32>
    %c0_6 = arith.constant 0 : index
    %c0_7 = arith.constant 0 : index
    %c0_8 = arith.constant 0 : index
    %9 = vector.load %arg4[%c0_6, %c0_7, %c0_8] : memref<1x8x256xf32, #tpu.memory_space<vmem>>, vector<1x8x256xf32>
    %10 = vector.shape_cast %9 : vector<1x8x256xf32> to vector<8x256xf32>
    %11 = vector.shape_cast %8 : vector<8x256xf32> to vector<1x8x256xf32>
    tpu.vector_store %arg4[%c0_6, %c0_7, %c0_8], %11 {strides = array<i32>} : memref<1x8x256xf32, #tpu.memory_space<vmem>>, vector<1x8x256xf32>,
    return
  }
  func.func @transform_0(%arg0: i32) -> (i32, i32, i32) {
    %c0_i32 = arith.constant 0 : i32
    %c0_i32_0 = arith.constant 0 : i32
    %c0_i32_1 = arith.constant 0 : i32
    return %arg0, %c0_i32, %c0_i32_0 : i32, i32, i32
  }
  func.func @transform_1(%arg0: i32) -> (i32, i32) {
    %c0_i32 = arith.constant 0 : i32
    %c0_i32_0 = arith.constant 0 : i32
    %c0_i32_1 = arith.constant 0 : i32
    return %c0_i32, %c0_i32_0 : i32, i32
  }
  func.func @transform_2(%arg0: i32) -> (i32, i32) {
    %c0_i32 = arith.constant 0 : i32
    %c0_i32_0 = arith.constant 0 : i32
    %c0_i32_1 = arith.constant 0 : i32
    return %c0_i32, %c0_i32_0 : i32, i32
  }
  func.func @transform_3(%arg0: i32) -> (i32, i32, i32) {
    %c0_i32 = arith.constant 0 : i32
    %c0_i32_0 = arith.constant 0 : i32
    %c0_i32_1 = arith.constant 0 : i32
    return %arg0, %c0_i32, %c0_i32_0 : i32, i32, i32
  }
}

module attributes {stable_mosaic.version = 11 : i64} {
  func.func @conv_stats_kernel(%arg0: i32, %arg1: memref<1x4x290xf32, #tpu.memory_space<vmem>>, %arg2: memref<9x8x4xbf16, #tpu.memory_space<vmem>>, %arg3: memref<2x256xf32, #tpu.memory_space<vmem>>, %arg4: memref<1x8x256xbf16, #tpu.memory_space<vmem>>, %arg5: memref<1x8x1xf32, #tpu.memory_space<vmem>>, %arg6: memref<1x8x1xf32, #tpu.memory_space<vmem>>, %arg7: memref<8x256xf32, #tpu.memory_space<vmem>>) attributes {dimension_semantics = [#tpu.dimension_semantics<parallel>], iteration_bounds = array<i64: 2>, scalar_prefetch = 0 : i64, scratch_operands = 1 : i64, tpu.core_type = #tpu.core_type<tc>, window_params = [{transform_indices = @transform_0, window_bounds = array<i64: 1, 4, 290>}, {pipeline_mode = #tpu.pipeline_mode<synchronous>, transform_indices = @transform_1, window_bounds = array<i64: 9, 8, 4>}, {pipeline_mode = #tpu.pipeline_mode<synchronous>, transform_indices = @transform_2, window_bounds = array<i64: 2, 256>}, {transform_indices = @transform_3, window_bounds = array<i64: 1, 8, 256>}, {transform_indices = @transform_4, window_bounds = array<i64: 1, 8, 1>}, {transform_indices = @transform_5, window_bounds = array<i64: 1, 8, 1>}]} {
    %c0 = arith.constant 0 : index
    %c0_0 = arith.constant 0 : index
    %c0_1 = arith.constant 0 : index
    %0 = vector.load %arg1[%c0, %c0_0, %c0_1] : memref<1x4x290xf32, #tpu.memory_space<vmem>>, vector<1x4x290xf32>
    %1 = vector.shape_cast %0 : vector<1x4x290xf32> to vector<4x290xf32>
    %c0_2 = arith.constant 0 : index
    %c0_3 = arith.constant 0 : index
    %2 = vector.load %arg3[%c0_2, %c0_3] : memref<2x256xf32, #tpu.memory_space<vmem>>, vector<1x256xf32>
    %c1 = arith.constant 1 : index
    %c0_4 = arith.constant 0 : index
    %3 = vector.load %arg3[%c1, %c0_4] : memref<2x256xf32, #tpu.memory_space<vmem>>, vector<1x256xf32>
    %4 = vector.extract_strided_slice %1 {offsets = [0, 0], sizes = [4, 256], strides = [1, 1]} : vector<4x290xf32> to vector<4x256xf32>
    %5 = vector.broadcast %2 : vector<1x256xf32> to vector<4x256xf32>
    %6 = arith.mulf %4, %5 : vector<4x256xf32>
    %c0_5 = arith.constant 0 : index
    %c0_6 = arith.constant 0 : index
    %c0_7 = arith.constant 0 : index
    %7 = vector.load %arg2[%c0_5, %c0_6, %c0_7] : memref<9x8x4xbf16, #tpu.memory_space<vmem>>, vector<1x8x4xbf16>
    %8 = vector.shape_cast %7 : vector<1x8x4xbf16> to vector<8x4xbf16>
    %9 = arith.truncf %6 : vector<4x256xf32> to vector<4x256xbf16>
    %cst = arith.constant dense<0.000000e+00> : vector<8x256xf32>
    %10 = tpu.matmul %8, %9, %cst {dimension_numbers = #tpu.dot_dimension_numbers<[1], [0], [0], [1], [0, 0, 1, 1], [], []>} : vector<8x4xbf16>, vector<4x256xbf16>, vector<8x256xf32> -> vector<8x256xf32>
    %c0_8 = arith.constant 0 : index
    %c0_9 = arith.constant 0 : index
    %11 = vector.load %arg7[%c0_8, %c0_9] : memref<8x256xf32, #tpu.memory_space<vmem>>, vector<8x256xf32>
    tpu.vector_store %arg7[%c0_8, %c0_9], %10 {strides = array<i32>} : memref<8x256xf32, #tpu.memory_space<vmem>>, vector<8x256xf32>,
    %12 = vector.extract_strided_slice %1 {offsets = [0, 1], sizes = [4, 256], strides = [1, 1]} : vector<4x290xf32> to vector<4x256xf32>
    %c1_10 = arith.constant 1 : index
    %c0_11 = arith.constant 0 : index
    %c0_12 = arith.constant 0 : index
    %13 = vector.load %arg2[%c1_10, %c0_11, %c0_12] : memref<9x8x4xbf16, #tpu.memory_space<vmem>>, vector<1x8x4xbf16>
    %14 = vector.shape_cast %13 : vector<1x8x4xbf16> to vector<8x4xbf16>
    %15 = arith.truncf %12 : vector<4x256xf32> to vector<4x256xbf16>
    %cst_13 = arith.constant dense<0.000000e+00> : vector<8x256xf32>
    %16 = tpu.matmul %14, %15, %cst_13 {dimension_numbers = #tpu.dot_dimension_numbers<[1], [0], [0], [1], [0, 0, 1, 1], [], []>} : vector<8x4xbf16>, vector<4x256xbf16>, vector<8x256xf32> -> vector<8x256xf32>
    %c0_14 = arith.constant 0 : index
    %c0_15 = arith.constant 0 : index
    %17 = vector.load %arg7[%c0_14, %c0_15] : memref<8x256xf32, #tpu.memory_space<vmem>>, vector<8x256xf32>
    %18 = arith.addf %17, %16 : vector<8x256xf32>
    %c0_16 = arith.constant 0 : index
    %c0_17 = arith.constant 0 : index
    %19 = vector.load %arg7[%c0_16, %c0_17] : memref<8x256xf32, #tpu.memory_space<vmem>>, vector<8x256xf32>
    tpu.vector_store %arg7[%c0_16, %c0_17], %18 {strides = array<i32>} : memref<8x256xf32, #tpu.memory_space<vmem>>, vector<8x256xf32>,
    %20 = vector.extract_strided_slice %1 {offsets = [0, 2], sizes = [4, 256], strides = [1, 1]} : vector<4x290xf32> to vector<4x256xf32>
    %21 = vector.broadcast %3 : vector<1x256xf32> to vector<4x256xf32>
    %22 = arith.mulf %20, %21 : vector<4x256xf32>
    %c2 = arith.constant 2 : index
    %c0_18 = arith.constant 0 : index
    %c0_19 = arith.constant 0 : index
    %23 = vector.load %arg2[%c2, %c0_18, %c0_19] : memref<9x8x4xbf16, #tpu.memory_space<vmem>>, vector<1x8x4xbf16>
    %24 = vector.shape_cast %23 : vector<1x8x4xbf16> to vector<8x4xbf16>
    %25 = arith.truncf %22 : vector<4x256xf32> to vector<4x256xbf16>
    %cst_20 = arith.constant dense<0.000000e+00> : vector<8x256xf32>
    %26 = tpu.matmul %24, %25, %cst_20 {dimension_numbers = #tpu.dot_dimension_numbers<[1], [0], [0], [1], [0, 0, 1, 1], [], []>} : vector<8x4xbf16>, vector<4x256xbf16>, vector<8x256xf32> -> vector<8x256xf32>
    %c0_21 = arith.constant 0 : index
    %c0_22 = arith.constant 0 : index
    %27 = vector.load %arg7[%c0_21, %c0_22] : memref<8x256xf32, #tpu.memory_space<vmem>>, vector<8x256xf32>
    %28 = arith.addf %27, %26 : vector<8x256xf32>
    %c0_23 = arith.constant 0 : index
    %c0_24 = arith.constant 0 : index
    %29 = vector.load %arg7[%c0_23, %c0_24] : memref<8x256xf32, #tpu.memory_space<vmem>>, vector<8x256xf32>
    tpu.vector_store %arg7[%c0_23, %c0_24], %28 {strides = array<i32>} : memref<8x256xf32, #tpu.memory_space<vmem>>, vector<8x256xf32>,
    %30 = vector.extract_strided_slice %1 {offsets = [0, 16], sizes = [4, 256], strides = [1, 1]} : vector<4x290xf32> to vector<4x256xf32>
    %31 = vector.broadcast %2 : vector<1x256xf32> to vector<4x256xf32>
    %32 = arith.mulf %30, %31 : vector<4x256xf32>
    %c3 = arith.constant 3 : index
    %c0_25 = arith.constant 0 : index
    %c0_26 = arith.constant 0 : index
    %33 = vector.load %arg2[%c3, %c0_25, %c0_26] : memref<9x8x4xbf16, #tpu.memory_space<vmem>>, vector<1x8x4xbf16>
    %34 = vector.shape_cast %33 : vector<1x8x4xbf16> to vector<8x4xbf16>
    %35 = arith.truncf %32 : vector<4x256xf32> to vector<4x256xbf16>
    %cst_27 = arith.constant dense<0.000000e+00> : vector<8x256xf32>
    %36 = tpu.matmul %34, %35, %cst_27 {dimension_numbers = #tpu.dot_dimension_numbers<[1], [0], [0], [1], [0, 0, 1, 1], [], []>} : vector<8x4xbf16>, vector<4x256xbf16>, vector<8x256xf32> -> vector<8x256xf32>
    %c0_28 = arith.constant 0 : index
    %c0_29 = arith.constant 0 : index
    %37 = vector.load %arg7[%c0_28, %c0_29] : memref<8x256xf32, #tpu.memory_space<vmem>>, vector<8x256xf32>
    %38 = arith.addf %37, %36 : vector<8x256xf32>
    %c0_30 = arith.constant 0 : index
    %c0_31 = arith.constant 0 : index
    %39 = vector.load %arg7[%c0_30, %c0_31] : memref<8x256xf32, #tpu.memory_space<vmem>>, vector<8x256xf32>
    tpu.vector_store %arg7[%c0_30, %c0_31], %38 {strides = array<i32>} : memref<8x256xf32, #tpu.memory_space<vmem>>, vector<8x256xf32>,
    %40 = vector.extract_strided_slice %1 {offsets = [0, 17], sizes = [4, 256], strides = [1, 1]} : vector<4x290xf32> to vector<4x256xf32>
    %c4 = arith.constant 4 : index
    %c0_32 = arith.constant 0 : index
    %c0_33 = arith.constant 0 : index
    %41 = vector.load %arg2[%c4, %c0_32, %c0_33] : memref<9x8x4xbf16, #tpu.memory_space<vmem>>, vector<1x8x4xbf16>
    %42 = vector.shape_cast %41 : vector<1x8x4xbf16> to vector<8x4xbf16>
    %43 = arith.truncf %40 : vector<4x256xf32> to vector<4x256xbf16>
    %cst_34 = arith.constant dense<0.000000e+00> : vector<8x256xf32>
    %44 = tpu.matmul %42, %43, %cst_34 {dimension_numbers = #tpu.dot_dimension_numbers<[1], [0], [0], [1], [0, 0, 1, 1], [], []>} : vector<8x4xbf16>, vector<4x256xbf16>, vector<8x256xf32> -> vector<8x256xf32>
    %c0_35 = arith.constant 0 : index
    %c0_36 = arith.constant 0 : index
    %45 = vector.load %arg7[%c0_35, %c0_36] : memref<8x256xf32, #tpu.memory_space<vmem>>, vector<8x256xf32>
    %46 = arith.addf %45, %44 : vector<8x256xf32>
    %c0_37 = arith.constant 0 : index
    %c0_38 = arith.constant 0 : index
    %47 = vector.load %arg7[%c0_37, %c0_38] : memref<8x256xf32, #tpu.memory_space<vmem>>, vector<8x256xf32>
    tpu.vector_store %arg7[%c0_37, %c0_38], %46 {strides = array<i32>} : memref<8x256xf32, #tpu.memory_space<vmem>>, vector<8x256xf32>,
    %48 = vector.extract_strided_slice %1 {offsets = [0, 18], sizes = [4, 256], strides = [1, 1]} : vector<4x290xf32> to vector<4x256xf32>
    %49 = vector.broadcast %3 : vector<1x256xf32> to vector<4x256xf32>
    %50 = arith.mulf %48, %49 : vector<4x256xf32>
    %c5 = arith.constant 5 : index
    %c0_39 = arith.constant 0 : index
    %c0_40 = arith.constant 0 : index
    %51 = vector.load %arg2[%c5, %c0_39, %c0_40] : memref<9x8x4xbf16, #tpu.memory_space<vmem>>, vector<1x8x4xbf16>
    %52 = vector.shape_cast %51 : vector<1x8x4xbf16> to vector<8x4xbf16>
    %53 = arith.truncf %50 : vector<4x256xf32> to vector<4x256xbf16>
    %cst_41 = arith.constant dense<0.000000e+00> : vector<8x256xf32>
    %54 = tpu.matmul %52, %53, %cst_41 {dimension_numbers = #tpu.dot_dimension_numbers<[1], [0], [0], [1], [0, 0, 1, 1], [], []>} : vector<8x4xbf16>, vector<4x256xbf16>, vector<8x256xf32> -> vector<8x256xf32>
    %c0_42 = arith.constant 0 : index
    %c0_43 = arith.constant 0 : index
    %55 = vector.load %arg7[%c0_42, %c0_43] : memref<8x256xf32, #tpu.memory_space<vmem>>, vector<8x256xf32>
    %56 = arith.addf %55, %54 : vector<8x256xf32>
    %c0_44 = arith.constant 0 : index
    %c0_45 = arith.constant 0 : index
    %57 = vector.load %arg7[%c0_44, %c0_45] : memref<8x256xf32, #tpu.memory_space<vmem>>, vector<8x256xf32>
    tpu.vector_store %arg7[%c0_44, %c0_45], %56 {strides = array<i32>} : memref<8x256xf32, #tpu.memory_space<vmem>>, vector<8x256xf32>,
    %58 = vector.extract_strided_slice %1 {offsets = [0, 32], sizes = [4, 256], strides = [1, 1]} : vector<4x290xf32> to vector<4x256xf32>
    %59 = vector.broadcast %2 : vector<1x256xf32> to vector<4x256xf32>
    %60 = arith.mulf %58, %59 : vector<4x256xf32>
    %c6 = arith.constant 6 : index
    %c0_46 = arith.constant 0 : index
    %c0_47 = arith.constant 0 : index
    %61 = vector.load %arg2[%c6, %c0_46, %c0_47] : memref<9x8x4xbf16, #tpu.memory_space<vmem>>, vector<1x8x4xbf16>
    %62 = vector.shape_cast %61 : vector<1x8x4xbf16> to vector<8x4xbf16>
    %63 = arith.truncf %60 : vector<4x256xf32> to vector<4x256xbf16>
    %cst_48 = arith.constant dense<0.000000e+00> : vector<8x256xf32>
    %64 = tpu.matmul %62, %63, %cst_48 {dimension_numbers = #tpu.dot_dimension_numbers<[1], [0], [0], [1], [0, 0, 1, 1], [], []>} : vector<8x4xbf16>, vector<4x256xbf16>, vector<8x256xf32> -> vector<8x256xf32>
    %c0_49 = arith.constant 0 : index
    %c0_50 = arith.constant 0 : index
    %65 = vector.load %arg7[%c0_49, %c0_50] : memref<8x256xf32, #tpu.memory_space<vmem>>, vector<8x256xf32>
    %66 = arith.addf %65, %64 : vector<8x256xf32>
    %c0_51 = arith.constant 0 : index
    %c0_52 = arith.constant 0 : index
    %67 = vector.load %arg7[%c0_51, %c0_52] : memref<8x256xf32, #tpu.memory_space<vmem>>, vector<8x256xf32>
    tpu.vector_store %arg7[%c0_51, %c0_52], %66 {strides = array<i32>} : memref<8x256xf32, #tpu.memory_space<vmem>>, vector<8x256xf32>,
    %68 = vector.extract_strided_slice %1 {offsets = [0, 33], sizes = [4, 256], strides = [1, 1]} : vector<4x290xf32> to vector<4x256xf32>
    %c7 = arith.constant 7 : index
    %c0_53 = arith.constant 0 : index
    %c0_54 = arith.constant 0 : index
    %69 = vector.load %arg2[%c7, %c0_53, %c0_54] : memref<9x8x4xbf16, #tpu.memory_space<vmem>>, vector<1x8x4xbf16>
    %70 = vector.shape_cast %69 : vector<1x8x4xbf16> to vector<8x4xbf16>
    %71 = arith.truncf %68 : vector<4x256xf32> to vector<4x256xbf16>
    %cst_55 = arith.constant dense<0.000000e+00> : vector<8x256xf32>
    %72 = tpu.matmul %70, %71, %cst_55 {dimension_numbers = #tpu.dot_dimension_numbers<[1], [0], [0], [1], [0, 0, 1, 1], [], []>} : vector<8x4xbf16>, vector<4x256xbf16>, vector<8x256xf32> -> vector<8x256xf32>
    %c0_56 = arith.constant 0 : index
    %c0_57 = arith.constant 0 : index
    %73 = vector.load %arg7[%c0_56, %c0_57] : memref<8x256xf32, #tpu.memory_space<vmem>>, vector<8x256xf32>
    %74 = arith.addf %73, %72 : vector<8x256xf32>
    %c0_58 = arith.constant 0 : index
    %c0_59 = arith.constant 0 : index
    %75 = vector.load %arg7[%c0_58, %c0_59] : memref<8x256xf32, #tpu.memory_space<vmem>>, vector<8x256xf32>
    tpu.vector_store %arg7[%c0_58, %c0_59], %74 {strides = array<i32>} : memref<8x256xf32, #tpu.memory_space<vmem>>, vector<8x256xf32>,
    %76 = vector.extract_strided_slice %1 {offsets = [0, 34], sizes = [4, 256], strides = [1, 1]} : vector<4x290xf32> to vector<4x256xf32>
    %77 = vector.broadcast %3 : vector<1x256xf32> to vector<4x256xf32>
    %78 = arith.mulf %76, %77 : vector<4x256xf32>
    %c8 = arith.constant 8 : index
    %c0_60 = arith.constant 0 : index
    %c0_61 = arith.constant 0 : index
    %79 = vector.load %arg2[%c8, %c0_60, %c0_61] : memref<9x8x4xbf16, #tpu.memory_space<vmem>>, vector<1x8x4xbf16>
    %80 = vector.shape_cast %79 : vector<1x8x4xbf16> to vector<8x4xbf16>
    %81 = arith.truncf %78 : vector<4x256xf32> to vector<4x256xbf16>
    %cst_62 = arith.constant dense<0.000000e+00> : vector<8x256xf32>
    %82 = tpu.matmul %80, %81, %cst_62 {dimension_numbers = #tpu.dot_dimension_numbers<[1], [0], [0], [1], [0, 0, 1, 1], [], []>} : vector<8x4xbf16>, vector<4x256xbf16>, vector<8x256xf32> -> vector<8x256xf32>
    %c0_63 = arith.constant 0 : index
    %c0_64 = arith.constant 0 : index
    %83 = vector.load %arg7[%c0_63, %c0_64] : memref<8x256xf32, #tpu.memory_space<vmem>>, vector<8x256xf32>
    %84 = arith.addf %83, %82 : vector<8x256xf32>
    %c0_65 = arith.constant 0 : index
    %c0_66 = arith.constant 0 : index
    %85 = vector.load %arg7[%c0_65, %c0_66] : memref<8x256xf32, #tpu.memory_space<vmem>>, vector<8x256xf32>
    tpu.vector_store %arg7[%c0_65, %c0_66], %84 {strides = array<i32>} : memref<8x256xf32, #tpu.memory_space<vmem>>, vector<8x256xf32>,
    %c0_67 = arith.constant 0 : index
    %c0_68 = arith.constant 0 : index
    %86 = vector.load %arg7[%c0_67, %c0_68] : memref<8x256xf32, #tpu.memory_space<vmem>>, vector<8x256xf32>
    %87 = arith.truncf %86 : vector<8x256xf32> to vector<8x256xbf16>
    %c0_69 = arith.constant 0 : index
    %c0_70 = arith.constant 0 : index
    %c0_71 = arith.constant 0 : index
    %88 = vector.load %arg4[%c0_69, %c0_70, %c0_71] : memref<1x8x256xbf16, #tpu.memory_space<vmem>>, vector<1x8x256xbf16>
    %89 = vector.shape_cast %88 : vector<1x8x256xbf16> to vector<8x256xbf16>
    %90 = vector.shape_cast %87 : vector<8x256xbf16> to vector<1x8x256xbf16>
    tpu.vector_store %arg4[%c0_69, %c0_70, %c0_71], %90 {strides = array<i32>} : memref<1x8x256xbf16, #tpu.memory_space<vmem>>, vector<1x8x256xbf16>,
    %cst_72 = arith.constant dense<0.000000e+00> : vector<8xf32>
    %91 = vector.multi_reduction <add>, %86, %cst_72 [1] : vector<8x256xf32> to vector<8xf32>
    %92 = vector.shape_cast %91 : vector<8xf32> to vector<8x1xf32>
    %c0_73 = arith.constant 0 : index
    %c0_74 = arith.constant 0 : index
    %c0_75 = arith.constant 0 : index
    %93 = vector.load %arg5[%c0_73, %c0_74, %c0_75] : memref<1x8x1xf32, #tpu.memory_space<vmem>>, vector<1x8x1xf32>
    %94 = vector.shape_cast %93 : vector<1x8x1xf32> to vector<8x1xf32>
    %95 = vector.shape_cast %92 : vector<8x1xf32> to vector<1x8x1xf32>
    tpu.vector_store %arg5[%c0_73, %c0_74, %c0_75], %95 {strides = array<i32>} : memref<1x8x1xf32, #tpu.memory_space<vmem>>, vector<1x8x1xf32>,
    %96 = arith.mulf %86, %86 : vector<8x256xf32>
    %cst_76 = arith.constant dense<0.000000e+00> : vector<8xf32>
    %97 = vector.multi_reduction <add>, %96, %cst_76 [1] : vector<8x256xf32> to vector<8xf32>
    %98 = vector.shape_cast %97 : vector<8xf32> to vector<8x1xf32>
    %c0_77 = arith.constant 0 : index
    %c0_78 = arith.constant 0 : index
    %c0_79 = arith.constant 0 : index
    %99 = vector.load %arg6[%c0_77, %c0_78, %c0_79] : memref<1x8x1xf32, #tpu.memory_space<vmem>>, vector<1x8x1xf32>
    %100 = vector.shape_cast %99 : vector<1x8x1xf32> to vector<8x1xf32>
    %101 = vector.shape_cast %98 : vector<8x1xf32> to vector<1x8x1xf32>
    tpu.vector_store %arg6[%c0_77, %c0_78, %c0_79], %101 {strides = array<i32>} : memref<1x8x1xf32, #tpu.memory_space<vmem>>, vector<1x8x1xf32>,
    return
  }
  func.func @transform_0(%arg0: i32) -> (i32, i32, i32) {
    %c0_i32 = arith.constant 0 : i32
    %c0_i32_0 = arith.constant 0 : i32
    %c0_i32_1 = arith.constant 0 : i32
    return %arg0, %c0_i32, %c0_i32_0 : i32, i32, i32
  }
  func.func @transform_1(%arg0: i32) -> (i32, i32, i32) {
    %c0_i32 = arith.constant 0 : i32
    %c0_i32_0 = arith.constant 0 : i32
    %c0_i32_1 = arith.constant 0 : i32
    %c0_i32_2 = arith.constant 0 : i32
    return %c0_i32, %c0_i32_0, %c0_i32_1 : i32, i32, i32
  }
  func.func @transform_2(%arg0: i32) -> (i32, i32) {
    %c0_i32 = arith.constant 0 : i32
    %c0_i32_0 = arith.constant 0 : i32
    %c0_i32_1 = arith.constant 0 : i32
    return %c0_i32, %c0_i32_0 : i32, i32
  }
  func.func @transform_3(%arg0: i32) -> (i32, i32, i32) {
    %c0_i32 = arith.constant 0 : i32
    %c0_i32_0 = arith.constant 0 : i32
    %c0_i32_1 = arith.constant 0 : i32
    return %arg0, %c0_i32, %c0_i32_0 : i32, i32, i32
  }
  func.func @transform_4(%arg0: i32) -> (i32, i32, i32) {
    %c0_i32 = arith.constant 0 : i32
    %c0_i32_0 = arith.constant 0 : i32
    %c0_i32_1 = arith.constant 0 : i32
    return %arg0, %c0_i32, %c0_i32_0 : i32, i32, i32
  }
  func.func @transform_5(%arg0: i32) -> (i32, i32, i32) {
    %c0_i32 = arith.constant 0 : i32
    %c0_i32_0 = arith.constant 0 : i32
    %c0_i32_1 = arith.constant 0 : i32
    return %arg0, %c0_i32, %c0_i32_0 : i32, i32, i32
  }
}

</mosaic_0001>

<bundles_post_ra>
// kernel: conv_block_forward.3
= control target key start
LH: loop header
LB: loop body
LE: loop exit
PB: predicated region body
PF: predicated region fallthrough
CT: control target
= control target key end

     0   :  { %s299_s12 = smov 0   ;;  %s322_s0 = inlined_call_operand.vmem [shape: bf16[2,8,256], index: 0, kind: input, shape index: {}]   ;;  %s323_s1 = inlined_call_operand.vmem [shape: f32[8,1], index: 1, kind: input, shape index: {}]   ;;  %s324_s2 = inlined_call_operand.vmem [shape: f32[8,1], index: 2, kind: input, shape index: {}]   ;;  %s325_s3 = inlined_call_operand.vmem [shape: f32[2,8,256], index: 3, kind: output, shape index: {}]  }
   0x1 LB: > { %s247_s13 = sadd.s32 4294967295, %s276_s12   ;;  %p251_p0 = scmp.ge.s32.totalorder %s276_s12, 1  ;;  %s276_s12 = sphi %s299_s12, %s13_s12  }
   0x2   : > { %p137_p1 = scmp.lt.s32.totalorder %s276_s12, 3 }
   0x4   : > { %p138_p2 = pnand %p251_p0, %p137_p1 }
   0x5   : > { %v174_v0 = vld [vmem:[%s323_s1] sm:$0xff] (!%p138_p2)  ;;  %v278_v1 = vmov (!%p138_p2), 0   ;;  %p161_p3 = scmp.lt.s32.totalorder (!%p138_p2), %s247_s13, 1 }
   0x6   : > { %141 = sbr.rel (%p138_p2) target bundleno = 142 (0x8e), region = 32  ;;  %269 = vset.pattern.permute.xlu0 (!%p138_p2), %v278_v1  ;;  %v182_v2 = vld [vmem:[%s324_s2] sm:$0xff] (!%p138_p2) }
   0x7   : > { %177 = vperm.xlu0 (!%p138_p2), %269, %v174_v0  }
   0xb   : > { %185 = vperm.xlu0 (!%p138_p2), %269, %v182_v2  }
   0xd   : > { %s327_s13 = smov (!%p161_p3, %s247_s13), 1 }
   0xe   : > { %s258_s18 = sshll.u32 %s327_s13, 3  ;;  %s259_s22 = sshll.u32 %s327_s13, 4 }
   0xf   : > { %s165_s21 = scalar_lea.vmem %s322_s0, %s258_s18  ;;  %s170_s25 = scalar_lea.vmem %s325_s3, %s259_s22 }
  0x10   : > { %v171_v3 = vld [vmem:[%s165_s21] sm:$0xff] }
  0x11   : > { %v172_v4 = vunpack.c.l.bf16 %v171_v3  ;;  %v173_v5 = vunpack.c.h.bf16 %v171_v3 }
  0x86   : > { %v178_v6 = vpop.permute.xlu0 %177 }
  0x87   : > { %v180_v7 = vmul.f32 %v178_v6, %v172_v4  ;;  %v181_v8 = vmul.f32 %v178_v6, %v173_v5 }
  0x8a   : > { %v186_v9 = vpop.permute.xlu0 %185 }
  0x8b   : > { %v188_v10 = vadd.f32 %v186_v9, %v180_v7  ;;  %v189_v11 = vadd.f32 %v186_v9, %v181_v8 }
  0x8d   : > { %190 = vst [vmem:[%s170_s25] sm:$0xff] %v188_v10  ;;  %191 = vst [vmem:[%s170_s25 + $0x8] sm:$0xff] %v189_v11 }
  0x8e PF: > { %s13_s12 = sadd.s32 1, %s276_s12  }
  0x8f   : > { %p10_p4 = scmp.ge.s32.totalorder %s13_s12, 4  }
  0x91   :  { %12 = sbr.rel (!%p10_p4) target bundleno = 1 (0x1), region = 62 }

// kernel: conv_block_forward.2
= control target key start
LH: loop header
LB: loop body
LE: loop exit
PB: predicated region body
PF: predicated region fallthrough
CT: control target
= control target key end

     0   :  { %s1256_s18 = smov 0   ;;  %s1396_s0 = inlined_call_operand.vmem [shape: f32[2,4,290], index: 0, kind: input, shape index: {}]   ;;  %s1397_s1 = inlined_call_operand.vmem [shape: bf16[9,8,4], index: 1, kind: input, shape index: {}]   ;;  %s1398_s2 = inlined_call_operand.vmem [shape: f32[2,256], index: 2, kind: input, shape index: {}]   ;;  %s1399_s3 = inlined_call_operand.vmem [shape: bf16[2,8,256], index: 3, kind: output, shape index: {0}]   ;;  %s1400_s4 = inlined_call_operand.vmem [shape: f32[2,8,1], index: 4, kind: output, shape index: {1}]   ;;  %s1401_s5 = inlined_call_operand.vmem [shape: f32[2,8,1], index: 5, kind: output, shape index: {2}]  }
   0x1 LB: > { %s1108_s19 = sadd.s32 4294967295, %s1210_s18   ;;  %p1112_p0 = scmp.ge.s32.totalorder %s1210_s18, 1  ;;  %s1210_s18 = sphi %s1256_s18, %s16_s18  }
   0x2   : > { %p192_p1 = scmp.lt.s32.totalorder %s1210_s18, 3 }
   0x4   : > { %p193_p2 = pnand %p1112_p0, %p192_p1 }
   0x5   : > { %v253_v0 = vlaneseq (!%p193_p2)  ;;  %p228_p3 = scmp.lt.s32.totalorder (!%p193_p2), %s1108_s19, 1  ;;  %v1118_v2 = vld [vmem:[%s1398_s2 + $0x1] ss:$2 sm:$0x3] (!%p193_p2)  ;;  %s1212_s28 = smov (!%p193_p2), 18   ;;  %v1218_v18 = vmov (!%p193_p2), 0  }
   0x6   : > { %196 = sbr.rel (%p193_p2) target bundleno = 658 (0x292), region = 32  ;;  %v249_v3 = vld [vmem:[%s1398_s2] ss:$2 sm:$0x3] (!%p193_p2)  ;;  %s1213_s29 = smov (!%p193_p2), 2   ;;  %632 = vmatprep.mubr.bf16.mxu0 (!%p193_p2), %v1218_v18  ;;  %313 = vmatprep.mubr.bf16.mxu1 (!%p193_p2), %v1218_v18  ;;  %vm274_vm0 = vcmask (!%p193_p2), 1041408  }
   0x7   : > { %v254_v1 = vshrl.u32 (!%p193_p2), %v253_v0, 7  ;;  %s1214_s30 = smov (!%p193_p2), 32   ;;  %s1215_s6 = smov (!%p193_p2), 16   ;;  %vm650_vm1 = vcmask (!%p193_p2), 146432   ;;  %vm270_vm2 = vcmask (!%p193_p2), 31744   ;;  %vm735_vm3 = vcmask (!%p193_p2), 261120  }
   0x8   : > { %s1216_s7 = smov (!%p193_p2), 34   ;;  %s1217_s8 = smov (!%p193_p2), 111   ;;  %v264_v27 = vld [vmem:[%s1397_s1] sm:$0xf] (!%p193_p2)  ;;  %vm588_vm4 = vcmask (!%p193_p2), 908288   ;;  %vm413_vm5 = vcmask (!%p193_p2), 15360  }
   0x9   : > { %v255_v4 = vsub.s32 (!%p193_p2), 0, %v254_v1  ;;  %v259_v5 = vsub.s32 (!%p193_p2), 1, %v254_v1  ;;  %s1219_s11 = smov (!%p193_p2), 110   ;;  %s1220_s12 = smov (!%p193_p2), 127   ;;  %v1130_v49 = vld [vmem:[%s1397_s1 + $0x10] sm:$0xf] (!%p193_p2) }
   0xa   : > { %s1221_s15 = smov (!%p193_p2), 96   ;;  %vm498_vm6 = vcmask (!%p193_p2), 130048   ;;  %s1222_s16 = smov (!%p193_p2), 126   ;;  %vm887_vm7 = vcmask (!%p193_p2), 277504   ;;  %vm673_vm8 = vcmask (!%p193_p2), 900096   ;;  %vm341_vm9 = vcmask (!%p193_p2), 1039360  }
   0xb   : > { %v404_v6 = vrot.slane (!%p193_p2), %v1118_v2, %v255_v4  ;;  %v408_v7 = vrot.slane (!%p193_p2), %v1118_v2, %v259_v5  ;;  %v256_v8 = vrot.slane (!%p193_p2), %v249_v3, %v255_v4  ;;  %v260_v9 = vrot.slane (!%p193_p2), %v249_v3, %v259_v5  ;;  %s1223_s17 = smov (!%p193_p2), 95   ;;  %s1224_s20 = smov (!%p193_p2), 112  }
   0xc   : > { %s1225_s21 = smov (!%p193_p2), 94   ;;  %vm758_vm10 = vcmask (!%p193_p2), 785408   ;;  %vm825_vm11 = vcmask (!%p193_p2), 777216   ;;  %vm436_vm12 = vcmask (!%p193_p2), 1031168   ;;  %vm521_vm13 = vcmask (!%p193_p2), 916480  }
   0xd   : > { %s1403_s19 = smov (!%p228_p3, %s1108_s19), 1  ;;  %v409_v10 = vcombine.low %v404_v6, %v408_v7  ;;  %v261_v11 = vcombine.low %v256_v8, %v260_v9  ;;  %vm910_vm14 = vcmask 769024   ;;  %vm983_vm15 = vcmask 7168  }
   0xe   : > { %s1180_s24 = smul.u32 12, %s1403_s19 }
   0xf   : > { %647 = vrot.lane.b32.xlu0 %v409_v10, %s1212_s28  ;;  %410 = vrot.lane.b32.xlu1 %v409_v10, %s1213_s29 }
  0x10   : > { %s232_s27 = scalar_lea.vmem %s1396_s0, %s1180_s24 }
  0x11   : > { %v1276_v12 = vld [vmem:[%s232_s27] sm:$0xff]  ;;  %v1284_v15 = vld [vmem:[%s232_s27 + $0x8] sm:$0xf] }
  0x12   : > { %v1280_v13 = vpack.c.bf16 %v1276_v12, %v1276_v12  ;;  %v327_v14 = vcombine.high %v1276_v12, %v1276_v12  ;;  %v1289_v16 = vpack.c.bf16 %v1284_v15, %v1284_v15  ;;  %v263_v19 = vmul.f32 %v261_v11, %v1276_v12 }
  0x13   : > { %732 = vrot.lane.b32.xlu0 %v261_v11, %s1214_s30  ;;  %495 = vrot.lane.b32.xlu1 %v261_v11, %s1215_s6 }
  0x14   : > { %v1291_v17 = vpack.c.bf16 %v327_v14, %v327_v14  ;;  %v266_v20 = vcombine.high %v263_v19, %v263_v19  ;;  %v268_v22 = vpack.c.bf16 %v263_v19, %v263_v19 }
  0x16   : > { %v269_v21 = vpack.c.bf16 %v266_v20, %v266_v20  ;;  %v276_v23 = vsel %vm274_vm0, %v268_v22, 0 }
  0x17   : > { %884 = vrot.lane.b32.xlu0 %v409_v10, %s1216_s7  ;;  %582 = vrot.lane.b32.xlu1 %v1280_v13, %s1217_s8 }
  0x18   : > { %1119 = vmatprep.subr.msk.bf16.mxu1 %vm274_vm0, %v269_v21 }
  0x19   : > { %282 = vmatpush1.bf16.msra.mxu1 %v276_v23 }
  0x1b   : > { %586 = vrot.lane.b32.xlu1 %v1289_v16, %s1217_s8  ;;  %584 = vrot.lane.b32.xlu0 %v1291_v17, %s1217_s8 }
  0x1c   : > { %1120 = vmatmul.mubr.msk.bf16.vlgmr.msra.gmra.mrb[0].mxu1 %vm270_vm2, %v264_v27 }
  0x1d   : > { %385 = vmatprep.mubr.bf16.mxu1 %v1218_v18 }
  0x81   : > { %v648_v24 = vpop.permute.xlu0 %647  ;;  %v411_v25 = vpop.permute.xlu1 %410 }
  0x82   : > { %v649_v26 = vrot.slane %v648_v24, 4  ;;  %v412_v41 = vrot.slane %v411_v25, 4 }
  0x84   : > { %v651_v28 = vsel %vm650_vm1, %v649_v26, %v648_v24  ;;  %v655_v29 = vmul.f32 %v649_v26, %v1284_v15  ;;  %v414_v48 = vsel %vm413_vm5, %v412_v41, %v411_v25  ;;  %v418_v58 = vmul.f32 %v412_v41, %v1284_v15 }
  0x85   : > { %v654_v30 = vmul.f32 %v651_v28, %v1276_v12  ;;  %v733_v31 = vpop.permute.xlu0 %732  ;;  %v1306_v32 = vpop.permute.xlu1 %495  ;;  %v417_v53 = vmul.f32 %v414_v48, %v1276_v12  ;;  %v1121_v28 = vld [vmem:[%s1397_s1 + $0x4] sm:$0xf]  ;;  %v1124_v48 = vld [vmem:[%s1397_s1 + $0x8] sm:$0xf] }
  0x86   : > { %v663_v33 = vpack.c.bf16 %v655_v29, %v655_v29  ;;  %v734_v34 = vrot.slane %v733_v31, 4  ;;  %v497_v57 = vrot.slane %v1306_v32, 4  ;;  %v426_v61 = vpack.c.bf16 %v418_v58, %v418_v58 }
  0x87   : > { %v659_v35 = vcombine.high %v654_v30, %v654_v30  ;;  %v661_v40 = vpack.c.bf16 %v654_v30, %v654_v30  ;;  %v424_v56 = vpack.c.bf16 %v417_v53, %v417_v53  ;;  %v422_v62 = vcombine.high %v417_v53, %v417_v53 }
  0x88   : > { %671 = vrot.lane.b32.xlu0 %v663_v33, %s1219_s11  ;;  %v736_v39 = vsel %vm735_vm3, %v734_v34, %v733_v31  ;;  %v740_v51 = vmul.f32 %v734_v34, %v1284_v15  ;;  %v499_v60 = vsel %vm498_vm6, %v497_v57, %v1306_v32  ;;  %v503_v4 = vmul.f32 %v497_v57, %v1284_v15 }
  0x89   : > { %v662_v36 = vpack.c.bf16 %v659_v35, %v659_v35  ;;  %v1309_v37 = vpop.permute.xlu0 %884  ;;  %v583_v38 = vpop.permute.xlu1 %582  ;;  %v739_v42 = vmul.f32 %v736_v39, %v1276_v12  ;;  %v502_v63 = vmul.f32 %v499_v60, %v1276_v12  ;;  %v425_v2 = vpack.c.bf16 %v422_v62, %v422_v62  ;;  %v1136_v35 = vld [vmem:[%s1397_s1 + $0x18] sm:$0xf] }
  0x8a   : > { %v748_v55 = vpack.c.bf16 %v740_v51, %v740_v51  ;;  %v886_v59 = vrot.slane %v1309_v37, 4  ;;  %v511_v7 = vpack.c.bf16 %v503_v4, %v503_v4 }
  0x8b   : > { %669 = vrot.lane.b32.xlu1 %v662_v36, %s1219_s11  ;;  %v744_v50 = vcombine.high %v739_v42, %v739_v42  ;;  %v746_v52 = vpack.c.bf16 %v739_v42, %v739_v42  ;;  %v509_v3 = vpack.c.bf16 %v502_v63, %v502_v63  ;;  %v507_v6 = vcombine.high %v502_v63, %v502_v63 }
  0x8c   : > { %667 = vrot.lane.b32.xlu0 %v661_v40, %s1219_s11  ;;  %v888_v0 = vsel %vm887_vm7, %v886_v59, %v1309_v37  ;;  %v892_v9 = vmul.f32 %v886_v59, %v1284_v15  ;;  %v1133_v15 = vld [vmem:[%s1397_s1 + $0x14] sm:$0xf]  ;;  %s1148_s11 = sshll.u32 %s1403_s19, 3 }
  0x8d   : > { %v587_v43 = vpop.permute.xlu1 %586  ;;  %v585_v44 = vpop.permute.xlu0 %584  ;;  %v747_v54 = vpack.c.bf16 %v744_v50, %v744_v50  ;;  %v891_v1 = vmul.f32 %v888_v0, %v1276_v12  ;;  %v510_v10 = vpack.c.bf16 %v507_v6, %v507_v6  ;;  %s237_s14 = scalar_lea.vmem %s1399_s3, %s1148_s11 }
  0x8e   : > { %v590_v45 = vsel %vm588_vm4, %v585_v44, %v587_v43  ;;  %v589_v46 = vsel %vm588_vm4, %v583_v38, %v585_v44  ;;  %v900_v12 = vpack.c.bf16 %v892_v9, %v892_v9 }
  0x8f   : > { %335 = vrot.lane.b32.xlu1 %v1280_v13, %s1220_s12  ;;  %1131 = vmatprep.subr.msk.bf16.mxu0 %vm274_vm0, %v590_v45  ;;  %v595_v47 = vsel %vm274_vm0, %v589_v46, 0  ;;  %v898_v5 = vpack.c.bf16 %v891_v1, %v891_v1  ;;  %v896_v8 = vcombine.high %v891_v1, %v891_v1 }
  0x90   : > { %337 = vrot.lane.b32.xlu0 %v1291_v17, %s1220_s12  ;;  %601 = vmatpush1.bf16.msra.mxu0 %v595_v47 }
  0x91   : > { %v899_v11 = vpack.c.bf16 %v896_v8, %v896_v8 }
  0x93   : > { %339 = vrot.lane.b32.xlu1 %v1289_v16, %s1220_s12  ;;  %1132 = vmatmul.mubr.msk.bf16.vlgmr.msra.gmra.mrb[0].mxu0 %vm270_vm2, %v1130_v49  ;;  %v1139_v49 = vld [vmem:[%s1397_s1 + $0x1c] sm:$0xf] }
  0x94   : > { %752 = vrot.lane.b32.xlu0 %v746_v52, %s1221_s15  ;;  %717 = vmatprep.mubr.bf16.mxu0 %v1218_v18 }
  0x97   : > { %754 = vrot.lane.b32.xlu1 %v747_v54, %s1221_s15 }
  0x98   : > { %756 = vrot.lane.b32.xlu0 %v748_v55, %s1221_s15 }
  0x9b   : > { %430 = vrot.lane.b32.xlu1 %v424_v56, %s1222_s16 }
  0x9c   : > { %819 = vrot.lane.b32.xlu0 %v1280_v13, %s1223_s17 }
  0x9f   : > { %434 = vrot.lane.b32.xlu1 %v426_v61, %s1222_s16  ;;  %v1142_v61 = vld [vmem:[%s1397_s1 + $0x20] sm:$0xf] }
  0xa0   : > { %823 = vrot.lane.b32.xlu0 %v1289_v16, %s1223_s17 }
  0xa3   : > { %821 = vrot.lane.b32.xlu1 %v1291_v17, %s1223_s17 }
  0xa4   : > { %432 = vrot.lane.b32.xlu0 %v425_v2, %s1222_s16  ;;  %s241_s16 = scalar_lea.vmem %s1400_s4, %s1148_s11 }
  0xa7   : > { %515 = vrot.lane.b32.xlu1 %v509_v3, %s1224_s20 }
  0xa8   : > { %904 = vrot.lane.b32.xlu0 %v898_v5, %s1225_s21 }
  0xab   : > { %519 = vrot.lane.b32.xlu1 %v511_v7, %s1224_s20 }
  0xac   : > { %517 = vrot.lane.b32.xlu0 %v510_v10, %s1224_s20 }
  0xaf   : > { %906 = vrot.lane.b32.xlu1 %v899_v11, %s1225_s21 }
  0xb0   : > { %908 = vrot.lane.b32.xlu0 %v900_v12, %s1225_s21  ;;  %s245_s21 = scalar_lea.vmem %s1401_s5, %s1148_s11 }
  0xfa   : > { %v672_v13 = vpop.permute.xlu0 %671 }
  0xfd   : > { %v670_v14 = vpop.permute.xlu1 %669 }
  0xfe   : > { %v675_v16 = vsel %vm673_vm8, %v670_v14, %v672_v13  ;;  %v668_v17 = vpop.permute.xlu0 %667 }
  0xff   : > { %v674_v19 = vsel %vm673_vm8, %v668_v17, %v670_v14  ;;  %1134 = vmatprep.subr.msk.bf16.mxu0 %vm274_vm0, %v675_v16 }
 0x100   : > { %v680_v20 = vsel %vm274_vm0, %v674_v19, 0 }
 0x101   : > { %v336_v21 = vpop.permute.xlu1 %335  ;;  %686 = vmatpush1.bf16.msra.mxu0 %v680_v20 }
 0x102   : > { %v338_v22 = vpop.permute.xlu0 %337 }
 0x103   : > { %v342_v23 = vsel %vm341_vm9, %v336_v21, %v338_v22 }
 0x104   : > { %1135 = vmatmul.mubr.msk.bf16.vlgmr.msra.gmra.mrb[0].mxu0 %vm270_vm2, %v1133_v15  ;;  %v348_v27 = vsel %vm274_vm0, %v342_v23, 0 }
 0x105   : > { %v340_v24 = vpop.permute.xlu1 %339  ;;  %802 = vmatprep.mubr.bf16.mxu0 %v1218_v18 }
 0x106   : > { %v343_v25 = vsel %vm341_vm9, %v338_v22, %v340_v24  ;;  %v753_v26 = vpop.permute.xlu0 %752 }
 0x107   : > { %1122 = vmatprep.subr.msk.bf16.mxu1 %vm274_vm0, %v343_v25 }
 0x108   : > { %354 = vmatpush1.bf16.msra.mxu1 %v348_v27 }
 0x109   : > { %v755_v29 = vpop.permute.xlu1 %754 }
 0x10a   : > { %v759_v30 = vsel %vm758_vm10, %v753_v26, %v755_v29  ;;  %v757_v31 = vpop.permute.xlu0 %756 }
 0x10b   : > { %v765_v32 = vsel %vm274_vm0, %v759_v30, 0  ;;  %v760_v33 = vsel %vm758_vm10, %v755_v29, %v757_v31  ;;  %1123 = vmatmul.mubr.msk.bf16.vlgmr.msra.gmra.mrb[0].mxu1 %vm270_vm2, %v1121_v28 }
 0x10c   : > { %1137 = vmatprep.subr.msk.bf16.mxu0 %vm274_vm0, %v760_v33  ;;  %480 = vmatprep.mubr.bf16.mxu1 %v1218_v18 }
 0x10d   : > { %v431_v34 = vpop.permute.xlu1 %430  ;;  %771 = vmatpush1.bf16.msra.mxu0 %v765_v32 }
 0x10e   : > { %v820_v36 = vpop.permute.xlu0 %819 }
 0x110   : > { %1138 = vmatmul.mubr.msk.bf16.vlgmr.msra.gmra.mrb[0].mxu0 %vm270_vm2, %v1136_v35 }
 0x111   : > { %v435_v37 = vpop.permute.xlu1 %434  ;;  %869 = vmatprep.mubr.bf16.mxu0 %v1218_v18 }
 0x112   : > { %v824_v38 = vpop.permute.xlu0 %823 }
 0x115   : > { %v822_v39 = vpop.permute.xlu1 %821 }
 0x116   : > { %v826_v40 = vsel %vm825_vm11, %v820_v36, %v822_v39  ;;  %v827_v41 = vsel %vm825_vm11, %v822_v39, %v824_v38  ;;  %v433_v42 = vpop.permute.xlu0 %432 }
 0x117   : > { %v832_v43 = vsel %vm274_vm0, %v826_v40, 0  ;;  %v437_v44 = vsel %vm436_vm12, %v431_v34, %v433_v42  ;;  %v438_v45 = vsel %vm436_vm12, %v433_v42, %v435_v37  ;;  %1140 = vmatprep.subr.msk.bf16.mxu0 %vm274_vm0, %v827_v41 }
 0x118   : > { %v443_v46 = vsel %vm274_vm0, %v437_v44, 0  ;;  %1125 = vmatprep.subr.msk.bf16.mxu1 %vm274_vm0, %v438_v45  ;;  %838 = vmatpush1.bf16.msra.mxu0 %v832_v43 }
 0x119   : > { %v516_v47 = vpop.permute.xlu1 %515  ;;  %449 = vmatpush1.bf16.msra.mxu1 %v443_v46 }
 0x11a   : > { %v905_v50 = vpop.permute.xlu0 %904 }
 0x11c   : > { %1126 = vmatmul.mubr.msk.bf16.vlgmr.msra.gmra.mrb[0].mxu1 %vm270_vm2, %v1124_v48  ;;  %1141 = vmatmul.mubr.msk.bf16.vlgmr.msra.gmra.mrb[0].mxu0 %vm270_vm2, %v1139_v49 }
 0x11d   : > { %v520_v51 = vpop.permute.xlu1 %519  ;;  %565 = vmatprep.mubr.bf16.mxu1 %v1218_v18  ;;  %954 = vmatprep.mubr.bf16.mxu0 %v1218_v18  ;;  %v1127_v18 = vld [vmem:[%s1397_s1 + $0xc] sm:$0xf] }
 0x11e   : > { %v518_v52 = vpop.permute.xlu0 %517 }
 0x11f   : > { %v522_v53 = vsel %vm521_vm13, %v516_v47, %v518_v52  ;;  %v523_v54 = vsel %vm521_vm13, %v518_v52, %v520_v51 }
 0x120   : > { %v528_v55 = vsel %vm274_vm0, %v522_v53, 0  ;;  %1128 = vmatprep.subr.msk.bf16.mxu1 %vm274_vm0, %v523_v54 }
 0x121   : > { %v907_v56 = vpop.permute.xlu1 %906  ;;  %534 = vmatpush1.bf16.msra.mxu1 %v528_v55 }
 0x122   : > { %v911_v57 = vsel %vm910_vm14, %v905_v50, %v907_v56  ;;  %v909_v58 = vpop.permute.xlu0 %908 }
 0x123   : > { %v917_v59 = vsel %vm274_vm0, %v911_v57, 0  ;;  %v912_v60 = vsel %vm910_vm14, %v907_v56, %v909_v58 }
 0x124   : > { %1143 = vmatprep.subr.msk.bf16.mxu0 %vm274_vm0, %v912_v60 }
 0x125   : > { %923 = vmatpush1.bf16.msra.mxu0 %v917_v59 }
 0x128   : > { %1129 = vmatmul.mubr.msk.bf16.vlgmr.msra.gmra.mrb[0].mxu1 %vm270_vm2, %v1127_v18  ;;  %1144 = vmatmul.mubr.msk.bf16.vlgmr.msra.gmra.mrb[0].mxu0 %vm270_vm2, %v1142_v61 }
 0x1fb   : > { %v567_v62 = vpop.f32.mrb[0].mxu1  ;;  %v956_v63 = vpop.f32.mrb[0].mxu0 }
 0x1fc   : > { %v1150_v0 = vadd.f32 %v956_v63, %v567_v62  ;;  %v569_v1 = vpop.f32.mrb[1].mxu1  ;;  %v958_v2 = vpop.f32.mrb[1].mxu0 }
 0x1fd   : > { %v1151_v3 = vadd.f32 %v958_v2, %v569_v1  ;;  %v571_v4 = vpop.f32.mrb[2].mxu1  ;;  %v960_v5 = vpop.f32.mrb[2].mxu0 }
 0x1fe   : > { %v572_v6 = vpop.f32.mrb[3].mxu1  ;;  %v961_v7 = vpop.f32.mrb[3].mxu0  ;;  %v985_v8 = vmul.f32 %v1150_v0, %v1150_v0 }
 0x1ff   : > { %v1149_v9 = vpack.c.bf16 %v1151_v3, %v1150_v0  ;;  %v980_v10 = vadd.f32 %v1151_v3, %v1150_v0  ;;  %v986_v11 = vmul.f32 %v1151_v3, %v1151_v3 }
 0x201   : > { %981 = vadd.xlane.f32.xlu1 %v980_v10  ;;  %v987_v12 = vadd.f32 %v986_v11, %v985_v8  ;;  %979 = vst [vmem:[%s237_s14] sm:$0xff] %v1149_v9 }
 0x203   : > { %988 = vadd.xlane.f32.xlu0 %v987_v12 }
 0x28e   : > { %v982_v13 = vpop.xlane.xlu1 %981 }
 0x28f   : > { %984 = vst.msk [vmem:[%s241_s16] sm:$0xff] %vm983_vm15, %v982_v13 }
 0x290   : > { %v989_v14 = vpop.xlane.xlu0 %988 }
 0x291   : > { %990 = vst.msk [vmem:[%s245_s21] sm:$0xff] %vm983_vm15, %v989_v14 }
 0x292 PF: > { %s16_s18 = sadd.s32 1, %s1210_s18  }
 0x293   : > { %p13_p4 = scmp.ge.s32.totalorder %s16_s18, 4  }
 0x295   :  { %15 = sbr.rel (!%p13_p4) target bundleno = 1 (0x1), region = 95 }

</bundles_post_ra>
